<compile_context>
chip_gen: v5e
topology: v5e:2x2
jax: 0.10.0
libtpu: 0.0.40
codegen_flags: <defaults>
</compile_context>

<pallas_src>
import functools

import jax
import jax.numpy as jnp
from jax import lax
from jax.experimental import pallas as pl
from jax.experimental.pallas import tpu as pltpu


def _cdf_block_kernel(cols_ref, hsi_ref, wk_ref, bc_ref,
                      w1_ref, b1_ref, w2t_ref, b2_ref,
                      o_hsi_ref, o_sar_ref, *, wp):
    """One batch element, channel-first (C, P) layout (P = Hp*Wp in lanes).

    cols_ref : (1, 3*Cin, H*Wp)  width-only im2col: cols[kw*Cin+ci, r*Wp+x]
                                 = sar[ci, r, x+kw]
    hsi_ref  : (1, Cout, P)
    wk_ref   : (3, Cout, 3*Cin)  BN-folded conv weight, [kh, co, kw*Cin+ci]
    bc_ref   : (Cout, 1)         BN-folded conv bias
    w1_ref   : (Cout, Cr)        SE squeeze weight
    b1_ref   : (1, Cr)           SE squeeze bias
    w2t_ref  : (Cout, Cr)        SE excite weight (transposed)
    b2_ref   : (Cout, 1)         SE excite bias
    o_*_ref  : (1, Cout, P)
    """
    p = o_hsi_ref.shape[2]                                   # Hp * Wp

    # ---- conv3x3 (VALID) + folded BN + ReLU, output (Cout, P) in f32 -------
    acc = None
    for kh in range(3):                                      # rows y+kh are a
        tap = cols_ref[0, :, pl.ds(kh * wp, p)]              # contiguous window
        part = jnp.dot(wk_ref[kh].astype(jnp.float32),
                       tap.astype(jnp.float32),
                       preferred_element_type=jnp.float32)   # (Cout, P)
        acc = part if acc is None else acc + part
    sar_c = jnp.maximum(acc + bc_ref[...].astype(jnp.float32), 0.0)

    hsi = hsi_ref[0].astype(jnp.float32)                     # (Cout, P)

    # ---- SE gate on avgpool(hsi * sar_c): VPU multiplies + XLU reductions --
    prod = hsi * sar_c
    pooled = jnp.sum(prod, axis=1, keepdims=True) * (1.0 / p)            # (Cout,1)
    z = jnp.sum(w1_ref[...].astype(jnp.float32) * pooled,
                axis=0, keepdims=True) + b1_ref[...].astype(jnp.float32)  # (1,Cr)
    z = jnp.maximum(z, 0.0)
    se = jnp.sum(w2t_ref[...].astype(jnp.float32) * z,
                 axis=1, keepdims=True) + b2_ref[...].astype(jnp.float32)  # (Cout,1)
    se = 1.0 / (1.0 + jnp.exp(-se))                                        # sigmoid

    # ---- CDF fusion + residuals (se broadcasts along the lane dim) ---------
    jh = se * hsi
    js = se * sar_c
    jd = jnp.abs(jh - js)
    jf = jh + js + jd
    o_hsi_ref[0] = (hsi + jf).astype(o_hsi_ref.dtype)
    o_sar_ref[0] = (sar_c + jf).astype(o_sar_ref.dtype)


def cdf_block(hsi_nchw, sar_nchw, params, *, eps=1e-5, interpret=False):
    """Fused CDFBlock forward.  NCHW in / NCHW out, like the PyTorch module."""
    B, Cin, H, W = sar_nchw.shape
    Cout = params["conv_w"].shape[0]
    Hp, Wp = H - 2, W - 2
    P = Hp * Wp
    Cr = params["se_w1"].shape[1]
    dtype = hsi_nchw.dtype
    assert hsi_nchw.shape == (B, Cout, Hp, Wp)

    # Fold inference-mode BatchNorm into the conv weight / bias.
    # TODO(synk): training-mode batch statistics are not implemented.
    scale = params["bn_gamma"] / jnp.sqrt(params["bn_var"] + eps)        # [Cout]
    w_fold = params["conv_w"] * scale[:, None, None, None]               # [Cout,Cin,3,3]
    b_fold = (params["conv_b"] - params["bn_mean"]) * scale + params["bn_beta"]

    # Conv weight as (kh, Cout, kw*Cin+ci): one 2-D matmul per kh tap.
    w_k = jnp.transpose(w_fold, (2, 0, 3, 1)).reshape(3, Cout, 3 * Cin)

    # Width-only im2col of the (small) sar input: (B, 3*Cin, H*Wp) with
    # cols[b, kw*Cin+ci, r*Wp+x] = sar[b, ci, r, x+kw].  The kh taps then sit
    # in contiguous row-windows of length P that the kernel slices directly.
    cols = jnp.concatenate([sar_nchw[:, :, :, kw:kw + Wp] for kw in range(3)],
                           axis=1).reshape(B, 3 * Cin, H * Wp)

    hsi_flat = hsi_nchw.reshape(B, Cout, P)       # free (contiguous) reshape

    itemsize = dtype.itemsize
    cost = pl.CostEstimate(
        flops=B * (2 * 9 * Cin * Cout * P + 14 * Cout * P + 4 * Cout * Cr),
        transcendentals=B * Cout,
        bytes_accessed=(cols.size + hsi_flat.size + 2 * B * Cout * P) * itemsize,
    )

    kernel = functools.partial(_cdf_block_kernel, wp=Wp)

    out_hsi, out_sar = pl.pallas_call(
        kernel,
        out_shape=(jax.ShapeDtypeStruct((B, Cout, P), dtype),
                   jax.ShapeDtypeStruct((B, Cout, P), dtype)),
        grid_spec=pltpu.PrefetchScalarGridSpec(
            num_scalar_prefetch=0,
            grid=(B,),
            in_specs=[
                pl.BlockSpec((1, 3 * Cin, H * Wp), lambda b: (b, 0, 0)),   # cols
                pl.BlockSpec((1, Cout, P), lambda b: (b, 0, 0)),           # hsi
                pl.BlockSpec((3, Cout, 3 * Cin), lambda b: (0, 0, 0)),     # conv W
                pl.BlockSpec((Cout, 1), lambda b: (0, 0)),                 # conv b
                pl.BlockSpec((Cout, Cr), lambda b: (0, 0)),                # SE w1
                pl.BlockSpec((1, Cr), lambda b: (0, 0)),                   # SE b1
                pl.BlockSpec((Cout, Cr), lambda b: (0, 0)),                # SE w2^T
                pl.BlockSpec((Cout, 1), lambda b: (0, 0)),                 # SE b2
            ],
            out_specs=[
                pl.BlockSpec((1, Cout, P), lambda b: (b, 0, 0)),
                pl.BlockSpec((1, Cout, P), lambda b: (b, 0, 0)),
            ],
        ),
        compiler_params=pltpu.CompilerParams(
            dimension_semantics=("parallel",)),
        cost_estimate=cost,
        interpret=interpret,
    )(cols, hsi_flat, w_k, b_fold.reshape(Cout, 1),
      params["se_w1"], params["se_b1"].reshape(1, Cr),
      params["se_w2"].T, params["se_b2"].reshape(Cout, 1))

    return (out_hsi.reshape(B, Cout, Hp, Wp),
            out_sar.reshape(B, Cout, Hp, Wp))


# ---------------------------------------------------------------------------
# Pure-JAX reference (mirrors the PyTorch forward, inference-mode BN).
# ---------------------------------------------------------------------------
def cdf_block_ref(hsi, sar, params, *, eps=1e-5):
    y = lax.conv_general_dilated(
        sar, params["conv_w"], window_strides=(1, 1), padding="VALID",
        dimension_numbers=("NCHW", "OIHW", "NCHW"))
    y = y + params["conv_b"][None, :, None, None]
    y = ((y - params["bn_mean"][None, :, None, None])
         / jnp.sqrt(params["bn_var"] + eps)[None, :, None, None]
         * params["bn_gamma"][None, :, None, None]
         + params["bn_beta"][None, :, None, None])
    sar_c = jnp.maximum(y, 0.0)

    jc_in = hsi * sar_c
    pooled = jnp.mean(jc_in, axis=(2, 3))                     # [B, C]
    z = jnp.maximum(pooled @ params["se_w1"] + params["se_b1"], 0.0)
    se = jax.nn.sigmoid(z @ params["se_w2"] + params["se_b2"])
    jc = se[:, :, None, None]
    jd = jnp.abs(jc * hsi - jc * sar_c)
    ja = jc * hsi + jc * sar_c
    jf = ja + jd
    return hsi + jf, sar_c + jf


if __name__ == "__main__":
    key = jax.random.PRNGKey(0)
    ks = jax.random.split(key, 12)

    B = 2
    in_channels = 4
    out_channels = 32            # "filter"; >= 16 so the SE bottleneck is >= 1
    H = W = 16                   # sar spatial; VALID 3x3 conv -> 14x14
    Hp, Wp = H - 2, W - 2
    Cr = out_channels // 16

    sar = jax.random.normal(ks[0], (B, in_channels, H, W), jnp.float32)
    hsi = jax.random.normal(ks[1], (B, out_channels, Hp, Wp), jnp.float32)

    params = dict(
        conv_w=jax.random.normal(ks[2], (out_channels, in_channels, 3, 3),
                                 jnp.float32) * (1.0 / jnp.sqrt(9.0 * in_channels)),
        conv_b=0.05 * jax.random.normal(ks[3], (out_channels,), jnp.float32),
        bn_gamma=1.0 + 0.1 * jax.random.normal(ks[4], (out_channels,), jnp.float32),
        bn_beta=0.1 * jax.random.normal(ks[5], (out_channels,), jnp.float32),
        bn_mean=0.1 * jax.random.normal(ks[6], (out_channels,), jnp.float32),
        bn_var=jnp.abs(1.0 + 0.1 * jax.random.normal(ks[7], (out_channels,),
                                                     jnp.float32)),
        se_w1=jax.random.normal(ks[8], (out_channels, Cr), jnp.float32)
        * (1.0 / jnp.sqrt(out_channels)),
        se_b1=0.05 * jax.random.normal(ks[9], (Cr,), jnp.float32),
        se_w2=jax.random.normal(ks[10], (Cr, out_channels), jnp.float32)
        * (1.0 / jnp.sqrt(Cr)),
        se_b2=0.05 * jax.random.normal(ks[11], (out_channels,), jnp.float32),
    )

    out_hsi, out_sar = cdf_block(hsi, sar, params)
    jax.block_until_ready((out_hsi, out_sar))

    ref_hsi, ref_sar = cdf_block_ref(hsi, sar, params)
    assert out_hsi.shape == (B, out_channels, Hp, Wp)
    assert out_sar.shape == (B, out_channels, Hp, Wp)
    assert jnp.allclose(out_hsi, ref_hsi, atol=5e-4, rtol=5e-4), "hsi branch mismatch"
    assert jnp.allclose(out_sar, ref_sar, atol=5e-4, rtol=5e-4), "sar branch mismatch"

    print("KERNEL_OK")
</pallas_src>

<mosaic_0001>
module attributes {stable_mosaic.version = 11 : i64} {
  func.func @_cdf_block_kernel(%arg0: i32, %arg1: memref<1x12x224xf32, #tpu.memory_space<vmem>>, %arg2: memref<1x32x196xf32, #tpu.memory_space<vmem>>, %arg3: memref<3x32x12xf32, #tpu.memory_space<vmem>>, %arg4: memref<32x1xf32, #tpu.memory_space<vmem>>, %arg5: memref<32x2xf32, #tpu.memory_space<vmem>>, %arg6: memref<1x2xf32, #tpu.memory_space<vmem>>, %arg7: memref<32x2xf32, #tpu.memory_space<vmem>>, %arg8: memref<32x1xf32, #tpu.memory_space<vmem>>, %arg9: memref<1x32x196xf32, #tpu.memory_space<vmem>>, %arg10: memref<1x32x196xf32, #tpu.memory_space<vmem>>) attributes {dimension_semantics = [#tpu.dimension_semantics<parallel>], iteration_bounds = array<i64: 2>, scalar_prefetch = 0 : i64, scratch_operands = 0 : i64, tpu.core_type = #tpu.core_type<tc>, window_params = [{transform_indices = @transform_0, window_bounds = array<i64: 1, 12, 224>}, {transform_indices = @transform_1, window_bounds = array<i64: 1, 32, 196>}, {pipeline_mode = #tpu.pipeline_mode<synchronous>, transform_indices = @transform_2, window_bounds = array<i64: 3, 32, 12>}, {pipeline_mode = #tpu.pipeline_mode<synchronous>, transform_indices = @transform_3, window_bounds = array<i64: 32, 1>}, {pipeline_mode = #tpu.pipeline_mode<synchronous>, transform_indices = @transform_4, window_bounds = array<i64: 32, 2>}, {pipeline_mode = #tpu.pipeline_mode<synchronous>, transform_indices = @transform_5, window_bounds = array<i64: 1, 2>}, {pipeline_mode = #tpu.pipeline_mode<synchronous>, transform_indices = @transform_6, window_bounds = array<i64: 32, 2>}, {pipeline_mode = #tpu.pipeline_mode<synchronous>, transform_indices = @transform_7, window_bounds = array<i64: 32, 1>}, {transform_indices = @transform_8, window_bounds = array<i64: 1, 32, 196>}, {transform_indices = @transform_9, window_bounds = array<i64: 1, 32, 196>}]} {
    %c0 = arith.constant 0 : index
    %c0_0 = arith.constant 0 : index
    %c0_1 = arith.constant 0 : index
    %0 = vector.load %arg1[%c0, %c0_0, %c0_1] : memref<1x12x224xf32, #tpu.memory_space<vmem>>, vector<1x12x196xf32>
    %1 = vector.shape_cast %0 : vector<1x12x196xf32> to vector<12x196xf32>
    %c0_2 = arith.constant 0 : index
    %c0_3 = arith.constant 0 : index
    %c0_4 = arith.constant 0 : index
    %2 = vector.load %arg3[%c0_2, %c0_3, %c0_4] : memref<3x32x12xf32, #tpu.memory_space<vmem>>, vector<1x32x12xf32>
    %3 = vector.shape_cast %2 : vector<1x32x12xf32> to vector<32x12xf32>
    %cst = arith.constant dense<0.000000e+00> : vector<32x196xf32>
    %4 = tpu.matmul %3, %1, %cst {dimension_numbers = #tpu.dot_dimension_numbers<[1], [0], [0], [1], [0, 0, 1, 1], [], []>} : vector<32x12xf32>, vector<12x196xf32>, vector<32x196xf32> -> vector<32x196xf32>
    %c0_5 = arith.constant 0 : index
    %c0_6 = arith.constant 0 : index
    %c14 = arith.constant 14 : index
    %5 = vector.load %arg1[%c0_5, %c0_6, %c14] : memref<1x12x224xf32, #tpu.memory_space<vmem>>, vector<1x12x196xf32>
    %6 = vector.shape_cast %5 : vector<1x12x196xf32> to vector<12x196xf32>
    %c1 = arith.constant 1 : index
    %c0_7 = arith.constant 0 : index
    %c0_8 = arith.constant 0 : index
    %7 = vector.load %arg3[%c1, %c0_7, %c0_8] : memref<3x32x12xf32, #tpu.memory_space<vmem>>, vector<1x32x12xf32>
    %8 = vector.shape_cast %7 : vector<1x32x12xf32> to vector<32x12xf32>
    %cst_9 = arith.constant dense<0.000000e+00> : vector<32x196xf32>
    %9 = tpu.matmul %8, %6, %cst_9 {dimension_numbers = #tpu.dot_dimension_numbers<[1], [0], [0], [1], [0, 0, 1, 1], [], []>} : vector<32x12xf32>, vector<12x196xf32>, vector<32x196xf32> -> vector<32x196xf32>
    %10 = arith.addf %4, %9 : vector<32x196xf32>
    %c0_10 = arith.constant 0 : index
    %c0_11 = arith.constant 0 : index
    %c28 = arith.constant 28 : index
    %11 = vector.load %arg1[%c0_10, %c0_11, %c28] : memref<1x12x224xf32, #tpu.memory_space<vmem>>, vector<1x12x196xf32>
    %12 = vector.shape_cast %11 : vector<1x12x196xf32> to vector<12x196xf32>
    %c2 = arith.constant 2 : index
    %c0_12 = arith.constant 0 : index
    %c0_13 = arith.constant 0 : index
    %13 = vector.load %arg3[%c2, %c0_12, %c0_13] : memref<3x32x12xf32, #tpu.memory_space<vmem>>, vector<1x32x12xf32>
    %14 = vector.shape_cast %13 : vector<1x32x12xf32> to vector<32x12xf32>
    %cst_14 = arith.constant dense<0.000000e+00> : vector<32x196xf32>
    %15 = tpu.matmul %14, %12, %cst_14 {dimension_numbers = #tpu.dot_dimension_numbers<[1], [0], [0], [1], [0, 0, 1, 1], [], []>} : vector<32x12xf32>, vector<12x196xf32>, vector<32x196xf32> -> vector<32x196xf32>
    %16 = arith.addf %10, %15 : vector<32x196xf32>
    %c0_15 = arith.constant 0 : index
    %c0_16 = arith.constant 0 : index
    %17 = vector.load %arg4[%c0_15, %c0_16] : memref<32x1xf32, #tpu.memory_space<vmem>>, vector<32x1xf32>
    %18 = vector.broadcast %17 : vector<32x1xf32> to vector<32x196xf32>
    %19 = arith.addf %16, %18 : vector<32x196xf32>
    %cst_17 = arith.constant 0.000000e+00 : f32
    %20 = vector.broadcast %cst_17 : f32 to vector<32x196xf32>
    %21 = arith.maximumf %19, %20 : vector<32x196xf32>
    %c0_18 = arith.constant 0 : index
    %c0_19 = arith.constant 0 : index
    %c0_20 = arith.constant 0 : index
    %22 = vector.load %arg2[%c0_18, %c0_19, %c0_20] : memref<1x32x196xf32, #tpu.memory_space<vmem>>, vector<1x32x196xf32>
    %23 = vector.shape_cast %22 : vector<1x32x196xf32> to vector<32x196xf32>
    %24 = arith.mulf %23, %21 : vector<32x196xf32>
    %cst_21 = arith.constant dense<0.000000e+00> : vector<32xf32>
    %25 = vector.multi_reduction <add>, %24, %cst_21 [1] : vector<32x196xf32> to vector<32xf32>
    %26 = vector.shape_cast %25 : vector<32xf32> to vector<32x1xf32>
    %cst_22 = arith.constant 0.00510204071 : f32
    %27 = vector.broadcast %cst_22 : f32 to vector<32x1xf32>
    %28 = arith.mulf %26, %27 : vector<32x1xf32>
    %c0_23 = arith.constant 0 : index
    %c0_24 = arith.constant 0 : index
    %29 = vector.load %arg5[%c0_23, %c0_24] : memref<32x2xf32, #tpu.memory_space<vmem>>, vector<32x2xf32>
    %30 = vector.broadcast %28 : vector<32x1xf32> to vector<32x2xf32>
    %31 = arith.mulf %29, %30 : vector<32x2xf32>
    %cst_25 = arith.constant dense<0.000000e+00> : vector<2xf32>
    %32 = vector.multi_reduction <add>, %31, %cst_25 [0] : vector<32x2xf32> to vector<2xf32>
    %33 = vector.shape_cast %32 : vector<2xf32> to vector<1x2xf32>
    %c0_26 = arith.constant 0 : index
    %c0_27 = arith.constant 0 : index
    %34 = vector.load %arg6[%c0_26, %c0_27] : memref<1x2xf32, #tpu.memory_space<vmem>>, vector<1x2xf32>
    %35 = arith.addf %33, %34 : vector<1x2xf32>
    %cst_28 = arith.constant 0.000000e+00 : f32
    %36 = vector.broadcast %cst_28 : f32 to vector<1x2xf32>
    %37 = arith.maximumf %35, %36 : vector<1x2xf32>
    %c0_29 = arith.constant 0 : index
    %c0_30 = arith.constant 0 : index
    %38 = vector.load %arg7[%c0_29, %c0_30] : memref<32x2xf32, #tpu.memory_space<vmem>>, vector<32x2xf32>
    %39 = vector.broadcast %37 : vector<1x2xf32> to vector<32x2xf32>
    %40 = arith.mulf %38, %39 : vector<32x2xf32>
    %cst_31 = arith.constant dense<0.000000e+00> : vector<32xf32>
    %41 = vector.multi_reduction <add>, %40, %cst_31 [1] : vector<32x2xf32> to vector<32xf32>
    %42 = vector.shape_cast %41 : vector<32xf32> to vector<32x1xf32>
    %c0_32 = arith.constant 0 : index
    %c0_33 = arith.constant 0 : index
    %43 = vector.load %arg8[%c0_32, %c0_33] : memref<32x1xf32, #tpu.memory_space<vmem>>, vector<32x1xf32>
    %44 = arith.addf %42, %43 : vector<32x1xf32>
    %cst_34 = arith.constant 0.000000e+00 : f32
    %45 = vector.broadcast %cst_34 : f32 to vector<32x1xf32>
    %46 = arith.subf %45, %44 : vector<32x1xf32>
    %47 = math.exp %46 : vector<32x1xf32>
    %cst_35 = arith.constant 1.000000e+00 : f32
    %48 = vector.broadcast %cst_35 : f32 to vector<32x1xf32>
    %49 = arith.addf %48, %47 : vector<32x1xf32>
    %cst_36 = arith.constant 1.000000e+00 : f32
    %50 = vector.broadcast %cst_36 : f32 to vector<32x1xf32>
    %51 = arith.divf %50, %49 : vector<32x1xf32>
    %52 = vector.broadcast %51 : vector<32x1xf32> to vector<32x196xf32>
    %53 = arith.mulf %52, %23 : vector<32x196xf32>
    %54 = vector.broadcast %51 : vector<32x1xf32> to vector<32x196xf32>
    %55 = arith.mulf %54, %21 : vector<32x196xf32>
    %56 = arith.subf %53, %55 : vector<32x196xf32>
    %57 = math.absf %56 : vector<32x196xf32>
    %58 = arith.addf %53, %55 : vector<32x196xf32>
    %59 = arith.addf %58, %57 : vector<32x196xf32>
    %60 = arith.addf %23, %59 : vector<32x196xf32>
    %c0_37 = arith.constant 0 : index
    %c0_38 = arith.constant 0 : index
    %c0_39 = arith.constant 0 : index
    %61 = vector.load %arg9[%c0_37, %c0_38, %c0_39] : memref<1x32x196xf32, #tpu.memory_space<vmem>>, vector<1x32x196xf32>
    %62 = vector.shape_cast %61 : vector<1x32x196xf32> to vector<32x196xf32>
    %63 = vector.shape_cast %60 : vector<32x196xf32> to vector<1x32x196xf32>
    tpu.vector_store %arg9[%c0_37, %c0_38, %c0_39], %63 {strides = array<i32>} : memref<1x32x196xf32, #tpu.memory_space<vmem>>, vector<1x32x196xf32>,
    %64 = arith.addf %21, %59 : vector<32x196xf32>
    %c0_40 = arith.constant 0 : index
    %c0_41 = arith.constant 0 : index
    %c0_42 = arith.constant 0 : index
    %65 = vector.load %arg10[%c0_40, %c0_41, %c0_42] : memref<1x32x196xf32, #tpu.memory_space<vmem>>, vector<1x32x196xf32>
    %66 = vector.shape_cast %65 : vector<1x32x196xf32> to vector<32x196xf32>
    %67 = vector.shape_cast %64 : vector<32x196xf32> to vector<1x32x196xf32>
    tpu.vector_store %arg10[%c0_40, %c0_41, %c0_42], %67 {strides = array<i32>} : memref<1x32x196xf32, #tpu.memory_space<vmem>>, vector<1x32x196xf32>,
    return
  }
  func.func @transform_0(%arg0: i32) -> (i32, i32, i32) {
    %c0_i32 = arith.constant 0 : i32
    %c0_i32_0 = arith.constant 0 : i32
    %c0_i32_1 = arith.constant 0 : i32
    return %arg0, %c0_i32, %c0_i32_0 : i32, i32, i32
  }
  func.func @transform_1(%arg0: i32) -> (i32, i32, i32) {
    %c0_i32 = arith.constant 0 : i32
    %c0_i32_0 = arith.constant 0 : i32
    %c0_i32_1 = arith.constant 0 : i32
    return %arg0, %c0_i32, %c0_i32_0 : i32, i32, i32
  }
  func.func @transform_2(%arg0: i32) -> (i32, i32, i32) {
    %c0_i32 = arith.constant 0 : i32
    %c0_i32_0 = arith.constant 0 : i32
    %c0_i32_1 = arith.constant 0 : i32
    %c0_i32_2 = arith.constant 0 : i32
    return %c0_i32, %c0_i32_0, %c0_i32_1 : i32, i32, i32
  }
  func.func @transform_3(%arg0: i32) -> (i32, i32) {
    %c0_i32 = arith.constant 0 : i32
    %c0_i32_0 = arith.constant 0 : i32
    %c0_i32_1 = arith.constant 0 : i32
    return %c0_i32, %c0_i32_0 : i32, i32
  }
  func.func @transform_4(%arg0: i32) -> (i32, i32) {
    %c0_i32 = arith.constant 0 : i32
    %c0_i32_0 = arith.constant 0 : i32
    %c0_i32_1 = arith.constant 0 : i32
    return %c0_i32, %c0_i32_0 : i32, i32
  }
  func.func @transform_5(%arg0: i32) -> (i32, i32) {
    %c0_i32 = arith.constant 0 : i32
    %c0_i32_0 = arith.constant 0 : i32
    %c0_i32_1 = arith.constant 0 : i32
    return %c0_i32, %c0_i32_0 : i32, i32
  }
  func.func @transform_6(%arg0: i32) -> (i32, i32) {
    %c0_i32 = arith.constant 0 : i32
    %c0_i32_0 = arith.constant 0 : i32
    %c0_i32_1 = arith.constant 0 : i32
    return %c0_i32, %c0_i32_0 : i32, i32
  }
  func.func @transform_7(%arg0: i32) -> (i32, i32) {
    %c0_i32 = arith.constant 0 : i32
    %c0_i32_0 = arith.constant 0 : i32
    %c0_i32_1 = arith.constant 0 : i32
    return %c0_i32, %c0_i32_0 : i32, i32
  }
  func.func @transform_8(%arg0: i32) -> (i32, i32, i32) {
    %c0_i32 = arith.constant 0 : i32
    %c0_i32_0 = arith.constant 0 : i32
    %c0_i32_1 = arith.constant 0 : i32
    return %arg0, %c0_i32, %c0_i32_0 : i32, i32, i32
  }
  func.func @transform_9(%arg0: i32) -> (i32, i32, i32) {
    %c0_i32 = arith.constant 0 : i32
    %c0_i32_0 = arith.constant 0 : i32
    %c0_i32_1 = arith.constant 0 : i32
    return %arg0, %c0_i32, %c0_i32_0 : i32, i32, i32
  }
}

</mosaic_0001>

<bundles_post_ra>
// kernel: tpu_custom_call.1
= control target key start
LH: loop header
LB: loop body
LE: loop exit
PB: predicated region body
PF: predicated region fallthrough
CT: control target
= control target key end

     0   :  { %s1765_s0 = inlined_call_operand.vmem [shape: f32[2,12,224], index: 0, kind: input, shape index: {}]   ;;  %s1766_s1 = inlined_call_operand.vmem [shape: f32[2,32,196], index: 1, kind: input, shape index: {}]   ;;  %s1767_s2 = inlined_call_operand.vmem [shape: f32[3,32,12], index: 2, kind: input, shape index: {}]   ;;  %s1768_s3 = inlined_call_operand.vmem [shape: f32[32,1], index: 3, kind: input, shape index: {}]   ;;  %s1769_s4 = inlined_call_operand.vmem [shape: f32[32,2], index: 4, kind: input, shape index: {}]   ;;  %s1770_s5 = inlined_call_operand.vmem [shape: f32[1,2], index: 5, kind: input, shape index: {}]   ;;  %s1771_s6 = inlined_call_operand.vmem [shape: f32[32,2], index: 6, kind: input, shape index: {}]   ;;  %s1772_s7 = inlined_call_operand.vmem [shape: f32[32,1], index: 7, kind: input, shape index: {}]   ;;  %s1773_s8 = inlined_call_operand.hbm [shape: f32[2,32,196], index: 8, kind: output, shape index: {0}]   ;;  %s1774_s9 = inlined_call_operand.hbm [shape: f32[2,32,196], index: 9, kind: output, shape index: {1}]  }
   0x1   :  { %1775 = sst [smem:[#allocation8_spill]] %s1765_s0 }
   0x2   :  { %1776 = sst [smem:[#allocation9_spill]] %s1766_s1 }
   0x3   :  { %1777 = sst [smem:[#allocation10_spill]] %s1767_s2 }
   0x4   :  { %1778 = sst [smem:[#allocation11_spill]] %s1768_s3 }
   0x5   :  { %15 = vsyncpa [#allocation3], 0 }
   0x6   :  { %17 = vsyncpa [#allocation3 + $0x1], 0 }
   0x7   :  { %18 = vsyncpa [#allocation5], 0 }
   0x8   :  { %20 = vsyncpa [#allocation5 + $0x1], 0  ;;  %s1387_s30 = smov 0   ;;  %s1389_s10 = smov 0  }
   0x9   :  { %s1391_s11 = smov 0   ;;  %s1393_s12 = smov 0  }
   0xa LB: > { %s1408_s13 = sadd.s32 4294967295, %s1330_s12   ;;  %s1094_s14 = sadd.s32 4294967294, %s1330_s12   ;;  %s1330_s12 = sphi %s1393_s12, %s1788_s12   ;;  %s1326_s11 = sphi %s1391_s11, %s1787_s11   ;;  %s1322_s10 = sphi %s1389_s10, %s1786_s10   ;;  %s1318_s30 = sphi %s1387_s30, %s1785_s30  }
   0xb   : > { %s1412_s15 = sadd.s32 1, %s1330_s12   ;;  %s211_s16 = sadd.s32 1, %s1326_s11 }
   0xc   : > { %s208_s17 = ssub.s32 %s1330_s12, %s1412_s15  ;;  %p221_p0 = scmp.ne.s32.totalorder %s1326_s11, %s1322_s10 }
   0xd   : > { %p209_p1 = scmp.eq.s32.totalorder %s208_s17, 0  ;;  %p222_p2 = scmp.eq.s32.totalorder %s1408_s13, 1 }
   0xe   : > { %p227_p3 = scmp.ne.s32.totalorder %s1322_s10, %s1318_s30  ;;  %p228_p4 = scmp.eq.s32.totalorder %s1094_s14, 1 }
   0xf   : > { %s1423_s18 = scalar_select %p209_p1, %s1326_s11, %s211_s16  }
  0x10   : > { %p1425_p5 = por %p222_p2, %p221_p0  ;;  %p1429_p6 = por %p228_p4, %p227_p3 }
  0x11   : > { %p1097_p7 = scmp.ge.s32.totalorder %s1330_s12, 1  ;;  %p306_p8 = scmp.lt.s32.totalorder %s1330_s12, 3 }
  0x13   : > { %p307_p9 = pnand %p1097_p7, %p306_p8 }
  0x14   : > { %p352_p10 = scmp.lt.s32.totalorder (!%p307_p9), %s1408_s13, 1  ;;  %s1781_s0 = sld [smem:[#allocation8_spill]] (!%p307_p9) }
  0x15   : > { %310 = sbr.rel (%p307_p9) target bundleno = 791 (0x317), region = 52  ;;  %s1332_s26 = smov (!%p307_p9), 114  }
  0x16   : > { %s1333_s27 = smov (!%p307_p9), 100   ;;  %s1782_s2 = sld [smem:[#allocation10_spill]] (!%p307_p9) }
  0x17   : > { %s1783_s3 = sld [smem:[#allocation11_spill]] (!%p307_p9)  ;;  %s1651_s17 = sand.u32 (!%p307_p9), 1, %s1322_s10  }
  0x18   : > { %s1784_s1 = sld [smem:[#allocation9_spill]] (!%p307_p9) }
  0x1a   : > { %s1437_s21 = scalar_select %p352_p10, %s1408_s13, 1  ;;  %vm405_vm0 = vcmask 1043456   ;;  %vm387_vm1 = vcmask 932864   ;;  %vm555_vm2 = vcmask 818176   ;;  %vm392_vm3 = vcmask 97280  }
  0x1b   : > { %v1334_v23 = vmov 0   ;;  %vm698_vm4 = vcmask 556032   ;;  %vm727_vm5 = vcmask 15360  }
  0x1c   : > { %s1150_s22 = sshll.u32 %s1437_s21, 5  ;;  %v1106_v14 = vld [vmem:[%s1782_s2 + $0x30] sm:$0xff]  ;;  %v1104_v19 = vld [vmem:[%s1782_s2 + $0x20] sm:$0xff]  ;;  %v1107_v22 = vld [vmem:[%s1782_s2 + $0x38] sm:$0xff]  ;;  %1217 = vset.pattern.permute.xlu0 %v1334_v23  ;;  %1218 = vset.pattern.permute.xlu1 %v1334_v23 }
  0x1d   : > { %s356_s25 = scalar_lea.vmem %s1781_s0, %s1150_s22  ;;  %v642_v21 = vld [vmem:[%s1783_s3] sm:$0xff]  ;;  %1219 = vset.pattern.permute.xlu2 %v1334_v23  ;;  %v1105_v24 = vld [vmem:[%s1782_s2 + $0x28] sm:$0xff]  ;;  %v644_v26 = vld [vmem:[%s1783_s3 + $0x10] sm:$0xff]  ;;  %s1098_s22 = sshll.u32 %s1651_s17, 6 }
  0x1e   : > { %v364_v0 = vld [vmem:[%s356_s25 + $0x10] sm:$0xf]  ;;  %v365_v1 = vld [vmem:[%s356_s25 + $0x18] sm:$0xf]  ;;  %v362_v2 = vld [vmem:[%s356_s25] sm:$0xff]  ;;  %s1658_s23 = scalar_lea.vmem [#allocation2], %s1098_s22 }
  0x1f   : > { %383 = vrot.lane.b32.xlu0 %v364_v0, %s1332_s26  ;;  %v363_v3 = vld [vmem:[%s356_s25 + $0x8] sm:$0xff]  ;;  %553 = vrot.lane.b32.xlu2 %v365_v1, %s1333_s27  ;;  %v366_v27 = vld [vmem:[%s1782_s2] sm:$0xff]  ;;  %s1663_s24 = scalar_lea.vmem [#allocation4], %s1098_s22  ;;  %s1152_s25 = sshll.u32 %s1408_s13, 6 }
  0x20   : > { %v1207_v4 = vpack.i.bf16 %v363_v3, %v362_v2  ;;  %v643_v25 = vld [vmem:[%s1783_s3 + $0x8] sm:$0xff]  ;;  %v645_v28 = vld [vmem:[%s1783_s3 + $0x18] sm:$0xff]  ;;  %v1128_v29 = vld [vmem:[%s1782_s2 + $0x40] sm:$0xff]  ;;  %s966_s13 = scalar_lea.hbm %s1773_s8, %s1152_s25  ;;  %s984_s22 = sshll.u32 %s1663_s24, 4  ;;  %s1717_s22 = int_to_ptr.vmem [resolvable:$true] %s984_s22 }
  0x21   : > { %v367_v30 = vld [vmem:[%s1782_s2 + $0x8] sm:$0xff]  ;;  %v368_v32 = vld [vmem:[%s1782_s2 + $0x10] sm:$0xff]  ;;  %v369_v34 = vld [vmem:[%s1782_s2 + $0x18] sm:$0xff]  ;;  %s969_s16 = sshll.u32 %s966_s13, 4  ;;  %s970_s16 = int_to_ptr.hbm [resolvable:$true] %s969_s16 }
  0x22   : > { %1208 = vrot.lane.b32.xlu1 %v1207_v4, %s1332_s26  ;;  %v1129_v31 = vld [vmem:[%s1782_s2 + $0x48] sm:$0xff]  ;;  %v1130_v33 = vld [vmem:[%s1782_s2 + $0x50] sm:$0xff]  ;;  %v1131_v35 = vld [vmem:[%s1782_s2 + $0x58] sm:$0xff] }
  0x27   : > { %385 = vrot.lane.b32.xlu0 %v365_v1, %s1332_s26  ;;  %1213 = vrot.lane.b32.xlu2 %v1207_v4, %s1333_s27 }
  0x2a   : > { %551 = vrot.lane.b32.xlu1 %v364_v0, %s1333_s27  ;;  %s1151_s27 = sshll.u32 %s1437_s21, 6  ;;  %s967_s21 = sshll.u32 %s1658_s23, 4  ;;  %s968_s21 = int_to_ptr.vmem [resolvable:$true] %s967_s21 }
  0x2b   : > { %s1533_s14 = scalar_lea.vmem %s1784_s1, %s1151_s27  ;;  %s1250_s27 = sshra.s32 %s970_s16, 4  ;;  %s1251_s27 = int_to_ptr.hbm [resolvable:$true] %s1250_s27 }
  0x2c   : > { %v1536_v57 = vld [vmem:[%s1533_s14] sm:$0xff]  ;;  %v1539_v58 = vld [vmem:[%s1533_s14 + $0x8] sm:$0xff]  ;;  %s1252_s13 = scalar_lea.hbm %s1251_s27, 64  ;;  %p1257_p0 = scmp.lt.s32.totalorder %s1251_s27, %s1773_s8 }
  0x2d   : > { %p1253_p11 = scmp.ne.s32.totalorder %s1251_s27, %s1252_s13 }
  0x2f   : > { %648 = vperm.xlu0 %1217, %v642_v21   ;;  %658 = vperm.xlu2 %1219, %v644_v26   ;;  %p1254_p12 = pnand %p1253_p11, %p1425_p5 }
  0x31   : > { %p1255_p13 = pneg %p1254_p12 }
  0x32   : > { %653 = vperm.xlu1 %1218, %v643_v25  }
  0x3a   : > { %663 = vperm.xlu1 %1218, %v645_v28  }
  0x79   : > { %v554_v5 = vpop.permute.xlu2 %553 }
  0x81   : > { %v1214_v11 = vpop.permute.xlu2 %1213 }
  0x82   : > { %v1215_v16 = vunpack.i.l.bf16 %v1214_v11  ;;  %v1216_v17 = vunpack.i.h.bf16 %v1214_v11 }
  0x84   : > { %v556_v20 = vsel %vm555_vm2, %v1215_v16, %v1216_v17 }
  0x91   : > { %v384_v6 = vpop.permute.xlu0 %383 }
  0x94   : > { %v1209_v7 = vpop.permute.xlu1 %1208 }
  0x95   : > { %v1211_v8 = vunpack.i.h.bf16 %v1209_v7  ;;  %v1210_v9 = vunpack.i.l.bf16 %v1209_v7 }
  0x97   : > { %v388_v13 = vsel %vm387_vm1, %v1210_v9, %v1211_v8 }
  0x99   : > { %v386_v10 = vpop.permute.xlu0 %385 }
  0x9a   : > { %1113 = vmatpush.msk.msra.mxu1 %vm405_vm0, %v386_v10  ;;  %1156 = vmatpush.msk.msra.mxu3 %vm405_vm0, %v386_v10  ;;  %v389_v12 = vsel %vm387_vm1, %v384_v6, %v386_v10 }
  0x9b   : > { %1108 = vmatpush.msk.msra.mxu0 %vm405_vm0, %v389_v12  ;;  %1154 = vmatpush.msk.msra.mxu2 %vm405_vm0, %v389_v12  ;;  %v1551_v12 = vld [vmem:[%s1533_s14 + $0x10] sm:$0xff] }
  0x9c   : > { %454 = vmatpush.msra.mxu1 %v1211_v8  ;;  %1157 = vmatpush.msra.mxu3 %v1211_v8  ;;  %v552_v15 = vpop.permute.xlu1 %551 }
  0x9d   : > { %425 = vmatpush.msra.mxu0 %v388_v13  ;;  %1155 = vmatpush.msra.mxu2 %v388_v13  ;;  %v557_v18 = vsel %vm555_vm2, %v552_v15, %v554_v5  ;;  %v1554_v13 = vld [vmem:[%s1533_s14 + $0x18] sm:$0xff] }
  0x9e   : > { %1116 = vmatmul.msk.f32.vlgmr.msra.gmra.mxu3 %vm392_vm3, %v1106_v14  ;;  %1111 = vmatmul.msk.f32.vlgmr.msra.gmra.mxu2 %vm392_vm3, %v1106_v14 }
  0x9f   : > { %1123 = vmatpush.msk.msrb.mxu3 %vm405_vm0, %v365_v1  ;;  %1118 = vmatpush.msk.msrb.mxu2 %vm405_vm0, %v364_v0 }
  0xa0   : > { %1137 = vmatpush.msk.msrb.mxu1 %vm405_vm0, %v554_v5  ;;  %1132 = vmatpush.msk.msrb.mxu0 %vm405_vm0, %v557_v18 }
  0xa1   : > { %1114 = vmatmul.msk.f32.vlgmr.msra.gmra.mxu1 %vm392_vm3, %v1104_v19  ;;  %528 = vmatpush.msrb.mxu3 %v363_v3  ;;  %v649_v50 = vpop.permute.xlu0 %648 }
  0xa2   : > { %1109 = vmatmul.msk.f32.vlgmr.msra.gmra.mxu0 %vm392_vm3, %v1104_v19  ;;  %499 = vmatpush.msrb.mxu2 %v362_v2 }
  0xa3   : > { %620 = vmatpush.msrb.mxu1 %v1216_v17  ;;  %591 = vmatpush.msrb.mxu0 %v556_v20 }
  0xa4   : > { %v654_v3 = vpop.permute.xlu1 %653 }
  0xa6   : > { %1117 = vmatmul.msk.f32.gmra.mxu3 %vm392_vm3, %v1107_v22  ;;  %1112 = vmatmul.msk.f32.gmra.mxu2 %vm392_vm3, %v1107_v22  ;;  %v659_v22 = vpop.permute.xlu2 %658 }
  0xa9   : > { %1115 = vmatmul.msk.f32.gmra.mxu1 %vm392_vm3, %v1105_v24 }
  0xaa   : > { %1110 = vmatmul.msk.f32.gmra.mxu0 %vm392_vm3, %v1105_v24 }
  0xae   : > { %1124 = vmatmul.msk.f32.vlgmr.msrb.gmra.mxu3 %vm392_vm3, %v366_v27  ;;  %1119 = vmatmul.msk.f32.vlgmr.msrb.gmra.mxu2 %vm392_vm3, %v366_v27 }
  0xb1   : > { %1138 = vmatmul.msk.f32.vlgmr.msrb.gmra.mxu1 %vm392_vm3, %v1128_v29 }
  0xb2   : > { %1133 = vmatmul.msk.f32.vlgmr.msrb.gmra.mxu0 %vm392_vm3, %v1128_v29  ;;  %v1566_v29 = vld [vmem:[%s1533_s14 + $0x20] sm:$0xff] }
  0xb6   : > { %1125 = vmatmul.msk.f32.gmra.mxu3 %vm392_vm3, %v367_v30  ;;  %1120 = vmatmul.msk.f32.gmra.mxu2 %vm392_vm3, %v367_v30  ;;  %v1569_v30 = vld [vmem:[%s1533_s14 + $0x28] sm:$0xff] }
  0xb9   : > { %1139 = vmatmul.msk.f32.gmra.mxu1 %vm392_vm3, %v1129_v31 }
  0xba   : > { %1134 = vmatmul.msk.f32.gmra.mxu0 %vm392_vm3, %v1129_v31 }
  0xbe   : > { %1126 = vmatmul.msk.f32.gmra.mxu3 %vm392_vm3, %v368_v32  ;;  %1121 = vmatmul.msk.f32.gmra.mxu2 %vm392_vm3, %v368_v32 }
  0xc1   : > { %1140 = vmatmul.msk.f32.gmra.mxu1 %vm392_vm3, %v1130_v33 }
  0xc2   : > { %1135 = vmatmul.msk.f32.gmra.mxu0 %vm392_vm3, %v1130_v33 }
  0xc6   : > { %1127 = vmatmul.msk.f32.gmra.mxu3 %vm392_vm3, %v369_v34  ;;  %1122 = vmatmul.msk.f32.gmra.mxu2 %vm392_vm3, %v369_v34 }
  0xc9   : > { %1141 = vmatmul.msk.f32.gmra.mxu1 %vm392_vm3, %v1131_v35 }
  0xca   : > { %1136 = vmatmul.msk.f32.gmra.mxu0 %vm392_vm3, %v1131_v35 }
 0x11e   : > { %v456_v36 = vpop.f32.mrf.mxu1 }
 0x11f   : > { %v427_v37 = vpop.f32.mrf.mxu0 }
 0x121   : > { %v462_v38 = vpop.f32.mrf.mxu3  ;;  %v433_v39 = vpop.f32.mrf.mxu2 }
 0x126   : > { %v459_v40 = vpop.f32.mrf.mxu1 }
 0x127   : > { %v430_v41 = vpop.f32.mrf.mxu0 }
 0x129   : > { %v1525_v42 = vpop.f32.mrf.mxu3  ;;  %v1527_v43 = vpop.f32.mrf.mxu2 }
 0x12e   : > { %v622_v44 = vpop.f32.mrf.mxu1 }
 0x12f   : > { %v593_v45 = vpop.f32.mrf.mxu0 }
 0x131   : > { %v530_v46 = vpop.f32.mrf.mxu3  ;;  %v501_v47 = vpop.f32.mrf.mxu2 }
 0x132   : > { %v531_v48 = vadd.f32 %v530_v46, %v456_v36  ;;  %v502_v49 = vadd.f32 %v501_v47, %v427_v37  ;;  %v664_v46 = vpop.permute.xlu1 %663 }
 0x134   : > { %v635_v51 = vadd.f32 %v622_v44, %v531_v48  ;;  %v634_v52 = vadd.f32 %v593_v45, %v502_v49 }
 0x136   : > { %v666_v53 = vadd.f32 %v649_v50, %v634_v52  ;;  %v667_v54 = vadd.f32 %v649_v50, %v635_v51  ;;  %v625_v55 = vpop.f32.mrf.mxu1  ;;  %v1583_v50 = vld [vmem:[%s1533_s14 + $0x30] sm:$0xff] }
 0x137   : > { %v596_v56 = vpop.f32.mrf.mxu0 }
 0x138   : > { %v1541_v59 = vmax.f32 %v666_v53, 0.0  ;;  %v1543_v60 = vmax.f32 %v667_v54, 0.0 }
 0x139   : > { %v533_v61 = vpop.f32.mrf.mxu3  ;;  %v504_v62 = vpop.f32.mrf.mxu2 }
 0x13a   : > { %v534_v63 = vadd.f32 %v533_v61, %v459_v40  ;;  %v505_v0 = vadd.f32 %v504_v62, %v430_v41  ;;  %v690_v1 = vmul.f32 %v1536_v57, %v1541_v59  ;;  %v691_v2 = vmul.f32 %v1539_v58, %v1543_v60 }
 0x13c   : > { %v637_v4 = vadd.f32 %v625_v55, %v534_v63  ;;  %v636_v5 = vadd.f32 %v596_v56, %v505_v0  ;;  %v699_v6 = vsel %vm698_vm4, %v691_v2, 0.0  ;;  %v720_v63 = vld [vmem:[%s1769_s4 + $0x8] sm:$0xff] }
 0x13d   : > { %v700_v7 = vadd.f32 %v699_v6, %v690_v1 }
 0x13e   : > { %v668_v8 = vadd.f32 %v654_v3, %v636_v5  ;;  %v669_v9 = vadd.f32 %v654_v3, %v637_v4  ;;  %v628_v10 = vpop.f32.mrf.mxu1  ;;  %v719_v3 = vld [vmem:[%s1769_s4] sm:$0xff]  ;;  %v721_v4 = vld [vmem:[%s1769_s4 + $0x10] sm:$0xff] }
 0x13f   : > { %701 = vadd.xlane.f32.xlu2 %v700_v7  ;;  %v599_v11 = vpop.f32.mrf.mxu0 }
 0x140   : > { %v1556_v14 = vmax.f32 %v668_v8, 0.0  ;;  %v1558_v15 = vmax.f32 %v669_v9, 0.0  ;;  %v722_v9 = vld [vmem:[%s1769_s4 + $0x18] sm:$0xff] }
 0x141   : > { %v536_v16 = vpop.f32.mrf.mxu3  ;;  %v507_v17 = vpop.f32.mrf.mxu2 }
 0x142   : > { %v537_v18 = vadd.f32 %v536_v16, %v462_v38  ;;  %v508_v19 = vadd.f32 %v507_v17, %v433_v39  ;;  %v692_v20 = vmul.f32 %v1551_v12, %v1556_v14  ;;  %v693_v21 = vmul.f32 %v1554_v13, %v1558_v15 }
 0x144   : > { %v639_v23 = vadd.f32 %v628_v10, %v537_v18  ;;  %v638_v24 = vadd.f32 %v599_v11, %v508_v19  ;;  %v703_v25 = vsel %vm698_vm4, %v693_v21, 0.0 }
 0x145   : > { %v704_v26 = vadd.f32 %v703_v25, %v692_v20 }
 0x146   : > { %v670_v27 = vadd.f32 %v659_v22, %v638_v24  ;;  %v671_v28 = vadd.f32 %v659_v22, %v639_v23  ;;  %v631_v33 = vpop.f32.mrf.mxu1 }
 0x147   : > { %705 = vadd.xlane.f32.xlu0 %v704_v26  ;;  %v602_v34 = vpop.f32.mrf.mxu0 }
 0x148   : > { %v1571_v31 = vmax.f32 %v670_v27, 0.0  ;;  %v1573_v32 = vmax.f32 %v671_v28, 0.0  ;;  %v741_v28 = vld [vmem:[%s1770_s5] sm:$0x1] }
 0x149   : > { %v539_v35 = vpop.f32.mrf.mxu3  ;;  %v510_v36 = vpop.f32.mrf.mxu2 }
 0x14a   : > { %v540_v37 = vadd.f32 %v539_v35, %v1525_v42  ;;  %v511_v38 = vadd.f32 %v510_v36, %v1527_v43  ;;  %v694_v39 = vmul.f32 %v1566_v29, %v1571_v31  ;;  %v695_v40 = vmul.f32 %v1569_v30, %v1573_v32  ;;  %v1586_v42 = vld [vmem:[%s1533_s14 + $0x38] sm:$0xff]  ;;  %v746_v36 = vld [vmem:[%s1771_s6 + $0x10] sm:$0xff]  ;;  %s983_s14 = scalar_lea.hbm %s1774_s9, %s1152_s25  ;;  %s950_s25 = scalar_lea.sflag [#allocation3], %s1651_s17 }
 0x14b   : > { %s986_s26 = sshll.u32 %s983_s14, 4  ;;  %s1256_s14 = scalar_lea.hbm %s1773_s8, 128  ;;  %s1719_s26 = int_to_ptr.hbm [resolvable:$true] %s986_s26 }
 0x14c   : > { %v641_v41 = vadd.f32 %v631_v33, %v540_v37  ;;  %v640_v44 = vadd.f32 %v602_v34, %v511_v38  ;;  %v707_v45 = vsel %vm698_vm4, %v695_v40, 0.0  ;;  %v745_v37 = vld [vmem:[%s1771_s6 + $0x8] sm:$0xff]  ;;  %v744_v38 = vld [vmem:[%s1771_s6] sm:$0xff]  ;;  %p1258_p1 = scmp.lt.s32.totalorder %s1256_s14, %s1252_s13 }
 0x14d   : > { %v708_v47 = vadd.f32 %v707_v45, %v694_v39 }
 0x14e   : > { %v673_v48 = vadd.f32 %v664_v46, %v641_v41  ;;  %v672_v49 = vadd.f32 %v664_v46, %v640_v44  ;;  %p1259_p2 = por %p1258_p1, %p1257_p0 }
 0x14f   : > { %709 = vadd.xlane.f32.xlu1 %v708_v47 }
 0x150   : > { %v1588_v43 = vmax.f32 %v673_v48, 0.0  ;;  %v1590_v51 = vmax.f32 %v672_v49, 0.0  ;;  %v747_v48 = vld [vmem:[%s1771_s6 + $0x18] sm:$0xff]  ;;  %p1260_p3 = pnand %p1259_p2, %p1255_p13 }
 0x152   : > { %v696_v52 = vmul.f32 %v1583_v50, %v1590_v51  ;;  %v697_v53 = vmul.f32 %v1586_v42, %v1588_v43 }
 0x154   : > { %v711_v54 = vsel %vm698_vm4, %v697_v53, 0.0  ;;  %v767_v53 = vld [vmem:[%s1772_s7 + $0x10] sm:$0xff] }
 0x155   : > { %v712_v55 = vadd.f32 %v711_v54, %v696_v52  ;;  %v766_v54 = vld [vmem:[%s1772_s7 + $0x8] sm:$0xff] }
 0x157   : > { %713 = vadd.xlane.f32.xlu2 %v712_v55  ;;  %v765_v55 = vld [vmem:[%s1772_s7] sm:$0xff] }
 0x1b2   : > { %v702_v61 = vpop.xlane.xlu2 %701 }
 0x1b3   : > { %v715_v1 = vmul.f32 0.0051020407, %v702_v61 }
 0x1b5   : > { %v723_v6 = vmul.f32 %v719_v3, %v715_v1 }
 0x1b7   : > { %v728_v11 = vsel %vm727_vm5, %v723_v6, 0.0 }
 0x1ba   : > { %v706_v56 = vpop.xlane.xlu0 %705 }
 0x1bb   : > { %v716_v62 = vmul.f32 0.0051020407, %v706_v56 }
 0x1bd   : > { %v724_v5 = vmul.f32 %v720_v63, %v716_v62 }
 0x1bf   : > { %v729_v8 = vsel %vm727_vm5, %v724_v5, 0.0 }
 0x1c0   : > { %v730_v18 = vadd.f32 %v729_v8, %v728_v11  ;;  %v768_v8 = vld [vmem:[%s1772_s7 + $0x18] sm:$0xff] }
 0x1c2   : > { %v710_v0 = vpop.xlane.xlu1 %709 }
 0x1c3   : > { %v717_v2 = vmul.f32 0.0051020407, %v710_v0 }
 0x1c5   : > { %v725_v7 = vmul.f32 %v721_v4, %v717_v2 }
 0x1c7   : > { %v731_v16 = vsel %vm727_vm5, %v725_v7, 0.0 }
 0x1c8   : > { %v732_v20 = vadd.f32 %v731_v16, %v730_v18 }
 0x1ca   : > { %v714_v10 = vpop.xlane.xlu2 %713 }
 0x1cb   : > { %v718_v17 = vmul.f32 0.0051020407, %v714_v10 }
 0x1cd   : > { %v726_v19 = vmul.f32 %v722_v9, %v718_v17 }
 0x1cf   : > { %v733_v21 = vsel %vm727_vm5, %v726_v19, 0.0 }
 0x1d0   : > { %v734_v22 = vadd.f32 %v733_v21, %v732_v20 }
 0x1d2   : > { %v735_v23 = vrot.slane %v734_v22, 4 }
 0x1d4   : > { %v736_v24 = vadd.f32 %v735_v23, %v734_v22 }
 0x1d6   : > { %v737_v25 = vrot.slane %v736_v24, 2 }
 0x1d8   : > { %v738_v26 = vadd.f32 %v737_v25, %v736_v24 }
 0x1da   : > { %v739_v27 = vrot.slane %v738_v26, 1 }
 0x1dc   : > { %v740_v33 = vadd.f32 %v739_v27, %v738_v26 }
 0x1de   : > { %v742_v34 = vadd.f32 %v741_v28, %v740_v33 }
 0x1e0   : > { %v743_v35 = vmax.f32 %v742_v34, 0.0 }
 0x1e2   : > { %v748_v39 = vperm.slane %v743_v35, 0 }
 0x1e4   : > { %v751_v40 = vmul.f32 %v748_v39, %v746_v36  ;;  %v750_v41 = vmul.f32 %v748_v39, %v745_v37  ;;  %v749_v44 = vmul.f32 %v748_v39, %v744_v38  ;;  %v752_v49 = vmul.f32 %v748_v39, %v747_v48 }
 0x1e6   : > { %v759_v45 = vsel %vm727_vm5, %v751_v40, 0.0  ;;  %v756_v46 = vsel %vm727_vm5, %v750_v41, 0.0  ;;  %v753_v47 = vsel %vm727_vm5, %v749_v44, 0.0  ;;  %v762_v52 = vsel %vm727_vm5, %v752_v49, 0.0 }
 0x1e7   : > { %760 = vadd.xlane.f32.xlu1 %v759_v45  ;;  %757 = vadd.xlane.f32.xlu0 %v756_v46 }
 0x1e8   : > { %754 = vadd.xlane.f32.xlu2 %v753_v47 }
 0x1f0   : > { %763 = vadd.xlane.f32.xlu2 %v762_v52 }
 0x25a   : > { %v761_v56 = vpop.xlane.xlu1 %760  ;;  %v758_v61 = vpop.xlane.xlu0 %757 }
 0x25b   : > { %v771_v62 = vadd.f32 %v767_v53, %v761_v56  ;;  %v770_v63 = vadd.f32 %v766_v54, %v758_v61  ;;  %v755_v0 = vpop.xlane.xlu2 %754 }
 0x25c   : > { %v769_v1 = vadd.f32 %v765_v55, %v755_v0 }
 0x25d   : > { %v775_v2 = vsub.f32 0.0, %v771_v62  ;;  %v774_v3 = vsub.f32 0.0, %v770_v63 }
 0x25e   : > { %v773_v4 = vsub.f32 0.0, %v769_v1 }
 0x25f   : > { %v781_v5 = vmul.f32 1.442695, %v775_v2  ;;  %v779_v6 = vmul.f32 1.442695, %v774_v3 }
 0x260   : > { %v777_v7 = vmul.f32 1.442695, %v773_v4 }
 0x261   : > { %1220 = vpow2.f32 %v781_v5 }
 0x262   : > { %1222 = vpow2.f32 %v779_v6 }
 0x263   : > { %1224 = vpow2.f32 %v777_v7  ;;  %v764_v9 = vpop.xlane.xlu2 %763 }
 0x264   : > { %v772_v10 = vadd.f32 %v768_v8, %v764_v9 }
 0x266   : > { %v776_v11 = vsub.f32 0.0, %v772_v10 }
 0x267   : > { %v1221_v16 = vpop.eup %1220 }
 0x268   : > { %v1223_v17 = vpop.eup %1222  ;;  %v787_v18 = vadd.f32 1.0, %v1221_v16  ;;  %v783_v21 = vmul.f32 1.442695, %v776_v11 }
 0x269   : > { %v1225_v19 = vpop.eup %1224  ;;  %v786_v20 = vadd.f32 1.0, %v1223_v17 }
 0x26a   : > { %1226 = vrcp.f32 %v787_v18  ;;  %v785_v22 = vadd.f32 1.0, %v1225_v19  ;;  %vm824_vm6 = vweird.f32 %v787_v18  ;;  %v828_v34 = vand.u32 2147483647, %v787_v18 }
 0x26b   : > { %1228 = vrcp.f32 %v786_v20  ;;  %v813_v38 = vand.u32 2147483647, %v786_v20  ;;  %v830_v39 = vand.u32 2147483648, %v787_v18  ;;  %v815_v40 = vand.u32 2147483648, %v786_v20 }
 0x26c   : > { %1230 = vrcp.f32 %v785_v22  ;;  %v800_v46 = vand.u32 2147483648, %v785_v22  ;;  %v798_v49 = vand.u32 2147483647, %v785_v22  ;;  %vm809_vm10 = vweird.f32 %v786_v20 }
 0x26d   : > { %1232 = vpow2.f32 %v783_v21  ;;  %vm829_vm12 = vcmp.eq.f32.partialorder %v828_v34, 8.507059e+37  ;;  %v831_v53 = vor.u32 1.1754944e-38, %v830_v39  ;;  %v816_v54 = vor.u32 1.1754944e-38, %v815_v40 }
 0x26e   : > { %vm794_vm14 = vweird.f32 %v785_v22  ;;  %vm814_vm15 = vcmp.eq.f32.partialorder %v813_v38, 8.507059e+37  ;;  %v801_v63 = vor.u32 1.1754944e-38, %v800_v46  ;;  %vm799_vm1 = vcmp.eq.f32.partialorder %v798_v49, 8.507059e+37 }
 0x270   : > { %v1227_v23 = vpop.eup %1226 }
 0x271   : > { %v1229_v24 = vpop.eup %1228  ;;  %v820_v25 = vmul.f32 %v1227_v23, %v787_v18  ;;  %vm825_vm7 = vweird.f32 %v1227_v23 }
 0x272   : > { %v1231_v26 = vpop.eup %1230  ;;  %v805_v27 = vmul.f32 %v1229_v24, %v786_v20  ;;  %vm810_vm8 = vweird.f32 %v1229_v24  ;;  %vm826_vm11 = vmor %vm824_vm6, %vm825_vm7 }
 0x273   : > { %v1233_v28 = vpop.eup %1232  ;;  %v821_v33 = vsub.f32 1.0, %v820_v25  ;;  %v790_v35 = vmul.f32 %v1231_v26, %v785_v22  ;;  %vm795_vm9 = vweird.f32 %v1231_v26  ;;  %vm811_vm13 = vmor %vm809_vm10, %vm810_vm8 }
 0x274   : > { %v788_v36 = vadd.f32 1.0, %v1233_v28  ;;  %v806_v37 = vsub.f32 1.0, %v805_v27  ;;  %vm796_vm0 = vmor %vm794_vm14, %vm795_vm9 }
 0x275   : > { %v822_v41 = vmul.f32 %v1227_v23, %v821_v33  ;;  %v791_v44 = vsub.f32 1.0, %v790_v35 }
 0x276   : > { %1234 = vrcp.f32 %v788_v36  ;;  %v807_v45 = vmul.f32 %v1229_v24, %v806_v37  ;;  %v845_v6 = vand.u32 2147483648, %v788_v36  ;;  %v843_v8 = vand.u32 2147483647, %v788_v36 }
 0x277   : > { %v823_v47 = vadd.f32 %v1227_v23, %v822_v41  ;;  %v792_v48 = vmul.f32 %v1231_v26, %v791_v44  ;;  %vm839_vm3 = vweird.f32 %v788_v36 }
 0x278   : > { %v808_v52 = vadd.f32 %v1229_v24, %v807_v45  ;;  %v846_v10 = vor.u32 1.1754944e-38, %v845_v6  ;;  %vm844_vm6 = vcmp.eq.f32.partialorder %v843_v8, 8.507059e+37 }
 0x279   : > { %v827_v55 = vsel %vm826_vm11, %v1227_v23, %v823_v47  ;;  %v793_v56 = vadd.f32 %v1231_v26, %v792_v48 }
 0x27a   : > { %v812_v61 = vsel %vm811_vm13, %v1229_v24, %v808_v52  ;;  %v832_v62 = vsel %vm829_vm12, %v831_v53, %v827_v55 }
 0x27b   : > { %v817_v0 = vsel %vm814_vm15, %v816_v54, %v812_v61  ;;  %861 = vperm.xlu2 %1219, %v832_v62   ;;  %v797_v1 = vsel %vm796_vm0, %v1231_v26, %v793_v56 }
 0x27c   : > { %v1235_v2 = vpop.eup %1234  ;;  %856 = vperm.xlu1 %1218, %v817_v0   ;;  %v802_v3 = vsel %vm799_vm1, %v801_v63, %v797_v1 }
 0x27d   : > { %851 = vperm.xlu0 %1217, %v802_v3   ;;  %v835_v4 = vmul.f32 %v1235_v2, %v788_v36  ;;  %vm840_vm2 = vweird.f32 %v1235_v2 }
 0x27e   : > { %vm841_vm5 = vmor %vm839_vm3, %vm840_vm2 }
 0x27f   : > { %v836_v5 = vsub.f32 1.0, %v835_v4 }
 0x281   : > { %v837_v7 = vmul.f32 %v1235_v2, %v836_v5 }
 0x283   : > { %v838_v9 = vadd.f32 %v1235_v2, %v837_v7 }
 0x285   : > { %v842_v11 = vsel %vm841_vm5, %v1235_v2, %v838_v9 }
 0x286   : > { %v847_v16 = vsel %vm844_vm6, %v846_v10, %v842_v11 }
 0x287   : > { %866 = vperm.xlu0 %1217, %v847_v16  }
 0x2d5   : > { %v862_v17 = vpop.permute.xlu2 %861 }
 0x2d6   : > { %v873_v18 = vmul.f32 %v862_v17, %v1566_v29  ;;  %v874_v19 = vmul.f32 %v862_v17, %v1569_v30  ;;  %v881_v20 = vmul.f32 %v862_v17, %v1571_v31  ;;  %v882_v21 = vmul.f32 %v862_v17, %v1573_v32 }
 0x2d8   : > { %v889_v22 = vsub.f32 %v873_v18, %v881_v20  ;;  %v890_v23 = vsub.f32 %v874_v19, %v882_v21  ;;  %v905_v26 = vadd.f32 %v881_v20, %v873_v18  ;;  %v906_v27 = vadd.f32 %v882_v21, %v874_v19 }
 0x2da   : > { %v897_v24 = vand.u32 2147483647, %v889_v22  ;;  %v898_v25 = vand.u32 2147483647, %v890_v23 }
 0x2dc   : > { %v913_v28 = vadd.f32 %v905_v26, %v897_v24  ;;  %v914_v33 = vadd.f32 %v906_v27, %v898_v25 }
 0x2de   : > { %v921_v34 = vadd.f32 %v913_v28, %v1566_v29  ;;  %v922_v35 = vadd.f32 %v914_v33, %v1569_v30  ;;  %v937_v36 = vadd.f32 %v913_v28, %v1571_v31  ;;  %v938_v37 = vadd.f32 %v914_v33, %v1573_v32 }
 0x2e0   : > { %929 = vst [vmem:[%s1658_s23 + $0x20] sm:$0xff] %v921_v34 }
 0x2e1   : > { %930 = vst.msk [vmem:[%s1658_s23 + $0x28] sm:$0xff] %vm698_vm4, %v922_v35 }
 0x2e2   : > { %945 = vst [vmem:[%s1663_s24 + $0x20] sm:$0xff] %v937_v36 }
 0x2e3   : > { %946 = vst.msk [vmem:[%s1663_s24 + $0x28] sm:$0xff] %vm698_vm4, %v938_v37 }
 0x2ee   : > { %v857_v29 = vpop.permute.xlu1 %856 }
 0x2ef   : > { %v871_v30 = vmul.f32 %v857_v29, %v1551_v12  ;;  %v872_v31 = vmul.f32 %v857_v29, %v1554_v13  ;;  %v879_v32 = vmul.f32 %v857_v29, %v1556_v14  ;;  %v880_v38 = vmul.f32 %v857_v29, %v1558_v15  ;;  %v852_v39 = vpop.permute.xlu0 %851 }
 0x2f0   : > { %v869_v40 = vmul.f32 %v852_v39, %v1536_v57  ;;  %v870_v41 = vmul.f32 %v852_v39, %v1539_v58  ;;  %v877_v44 = vmul.f32 %v852_v39, %v1541_v59  ;;  %v878_v45 = vmul.f32 %v852_v39, %v1543_v60 }
 0x2f1   : > { %v887_v46 = vsub.f32 %v871_v30, %v879_v32  ;;  %v888_v47 = vsub.f32 %v872_v31, %v880_v38  ;;  %v903_v54 = vadd.f32 %v879_v32, %v871_v30  ;;  %v904_v55 = vadd.f32 %v880_v38, %v872_v31 }
 0x2f2   : > { %v885_v48 = vsub.f32 %v869_v40, %v877_v44  ;;  %v886_v49 = vsub.f32 %v870_v41, %v878_v45  ;;  %v901_v62 = vadd.f32 %v877_v44, %v869_v40  ;;  %v902_v63 = vadd.f32 %v878_v45, %v870_v41 }
 0x2f3   : > { %v895_v52 = vand.u32 2147483647, %v887_v46  ;;  %v896_v53 = vand.u32 2147483647, %v888_v47 }
 0x2f4   : > { %v893_v56 = vand.u32 2147483647, %v885_v48  ;;  %v894_v61 = vand.u32 2147483647, %v886_v49 }
 0x2f5   : > { %v911_v0 = vadd.f32 %v903_v54, %v895_v52  ;;  %v912_v1 = vadd.f32 %v904_v55, %v896_v53 }
 0x2f6   : > { %v909_v2 = vadd.f32 %v901_v62, %v893_v56  ;;  %v910_v3 = vadd.f32 %v902_v63, %v894_v61 }
 0x2f7   : > { %v919_v4 = vadd.f32 %v911_v0, %v1551_v12  ;;  %v920_v5 = vadd.f32 %v912_v1, %v1554_v13  ;;  %v935_v6 = vadd.f32 %v911_v0, %v1556_v14  ;;  %v936_v7 = vadd.f32 %v912_v1, %v1558_v15 }
 0x2f8   : > { %v917_v8 = vadd.f32 %v909_v2, %v1536_v57  ;;  %v918_v9 = vadd.f32 %v910_v3, %v1539_v58  ;;  %v933_v15 = vadd.f32 %v909_v2, %v1541_v59  ;;  %v934_v57 = vadd.f32 %v910_v3, %v1543_v60 }
 0x2f9   : > { %927 = vst [vmem:[%s1658_s23 + $0x10] sm:$0xff] %v919_v4  ;;  %v867_v10 = vpop.permute.xlu0 %866 }
 0x2fa   : > { %928 = vst.msk [vmem:[%s1658_s23 + $0x18] sm:$0xff] %vm698_vm4, %v920_v5  ;;  %v875_v11 = vmul.f32 %v867_v10, %v1583_v50  ;;  %v876_v12 = vmul.f32 %v867_v10, %v1586_v42  ;;  %v883_v13 = vmul.f32 %v867_v10, %v1590_v51  ;;  %v884_v14 = vmul.f32 %v867_v10, %v1588_v43 }
 0x2fb   : > { %943 = vst [vmem:[%s1663_s24 + $0x10] sm:$0xff] %v935_v6 }
 0x2fc   : > { %944 = vst.msk [vmem:[%s1663_s24 + $0x18] sm:$0xff] %vm698_vm4, %v936_v7  ;;  %v891_v58 = vsub.f32 %v875_v11, %v883_v13  ;;  %v892_v16 = vsub.f32 %v876_v12, %v884_v14  ;;  %v907_v19 = vadd.f32 %v883_v13, %v875_v11  ;;  %v908_v20 = vadd.f32 %v884_v14, %v876_v12 }
 0x2fd   : > { %925 = vst [vmem:[%s1658_s23] sm:$0xff] %v917_v8 }
 0x2fe   : > { %926 = vst.msk [vmem:[%s1658_s23 + $0x8] sm:$0xff] %vm698_vm4, %v918_v9  ;;  %v899_v17 = vand.u32 2147483647, %v891_v58  ;;  %v900_v18 = vand.u32 2147483647, %v892_v16 }
 0x2ff   : > { %941 = vst [vmem:[%s1663_s24] sm:$0xff] %v933_v15 }
 0x300   : > { %942 = vst.msk [vmem:[%s1663_s24 + $0x8] sm:$0xff] %vm698_vm4, %v934_v57  ;;  %v915_v59 = vadd.f32 %v907_v19, %v899_v17  ;;  %v916_v60 = vadd.f32 %v908_v20, %v900_v18 }
 0x302   : > { %v923_v21 = vadd.f32 %v915_v59, %v1583_v50  ;;  %v924_v22 = vadd.f32 %v916_v60, %v1586_v42  ;;  %v939_v23 = vadd.f32 %v915_v59, %v1590_v51  ;;  %v940_v24 = vadd.f32 %v916_v60, %v1588_v43 }
 0x304   : > { %931 = vst [vmem:[%s1658_s23 + $0x30] sm:$0xff] %v923_v21 }
 0x305   : > { %932 = vst.msk [vmem:[%s1658_s23 + $0x38] sm:$0xff] %vm698_vm4, %v924_v22 }
 0x306   : > { %947 = vst [vmem:[%s1663_s24 + $0x30] sm:$0xff] %v939_v23 }
 0x307   : > { %948 = vst.msk [vmem:[%s1663_s24 + $0x38] sm:$0xff] %vm698_vm4, %v940_v24 }
 0x308   : > { %1263 = shalt.err (!%p1260_p3)
}
 0x309   : > { %s1335_s24 = smov 256   ;;  %s1336_s1 = smov 16  }
 0x30a   : > { %1158 = dma.vmem_to_hbm [thread:$0]  (%p1425_p5), %s968_s21, 1024, %s970_s16, %s950_s25, %s1335_s24, %s1335_s24, %s1336_s1  }
 0x30b   : > { %s955_s2 = scalar_lea.sflag [#allocation5], %s1651_s17  ;;  %s1278_s3 = sshra.s32 %s1719_s26, 4  ;;  %s1279_s3 = int_to_ptr.hbm [resolvable:$true] %s1278_s3 }
 0x30c   : > { %s1280_s28 = scalar_lea.hbm %s1279_s3, 64  ;;  %s1284_s13 = scalar_lea.hbm %s1774_s9, 128 }
 0x30d   : > { %p1281_p4 = scmp.ne.s32.totalorder %s1279_s3, %s1280_s28  ;;  %p1285_p9 = scmp.lt.s32.totalorder %s1279_s3, %s1774_s9 }
 0x30e   : > { %p1286_p10 = scmp.lt.s32.totalorder %s1284_s13, %s1280_s28 }
 0x30f   : > { %p1282_p7 = pnand %p1281_p4, %p1425_p5 }
 0x310   : > { %p1287_p11 = por %p1286_p10, %p1285_p9 }
 0x311   : > { %p1283_p8 = pneg %p1282_p7 }
 0x313   : > { %p1288_p12 = pnand %p1287_p11, %p1283_p8 }
 0x315   : > { %1291 = shalt.err (!%p1288_p12)
}
 0x316   : > { %1159 = dma.vmem_to_hbm [thread:$0]  (%p1425_p5), %s1717_s22, 1024, %s1719_s26, %s955_s2, %s1335_s24, %s1335_s24, %s1336_s1  }
 0x317 PF: > { %p1169_p13 = scmp.ge.s32.totalorder %s1330_s12, 2  ;;  %s1001_s17 = sand.u32 1, %s1318_s30  }
 0x318   : > { %s1002_s21 = scalar_lea.sflag [#allocation3], %s1001_s17 }
 0x319   : > { %p1163_p0 = pnand %p1169_p13, %p1429_p6 }
 0x31b   : > { %p1164_p1 = pneg %p1163_p0 }
 0x31d   : > { %1309 = dma.done.wait (%p1164_p1), %s1002_s21, 1024  }
 0x31e   : > { %1311 = vsyncadd (%p1164_p1), %s1002_s21, 4294966272  ;;  %s1012_s3 = scalar_lea.sflag [#allocation5], %s1001_s17 }
 0x31f   : > { %1313 = dma.done.wait (%p1164_p1), %s1012_s3, 1024  }
 0x320   : > { %1315 = vsyncadd (%p1164_p1), %s1012_s3, 4294966272  ;;  %p23_p5 = scmp.ge.s32.totalorder %s1412_s15, 4   ;;  %s1785_s30 = smov %s1322_s10 }
 0x321   : > { %s1786_s10 = smov %s1326_s11  ;;  %s1787_s11 = smov %s1423_s18 }
 0x322   : > { %s1788_s12 = smov %s1412_s15  ;;  %25 = sbr.rel (!%p23_p5) target bundleno = 10 (0xa), region = 109 }
 0x327   :  { %1018 = vsyncpa [#allocation3], 1 }
 0x328   :  { %1020 = vsyncpa [#allocation3 + $0x1], 1 }
 0x329   :  { %1021 = vsyncpa [#allocation5], 1 }
 0x32a   :  { %1023 = vsyncpa [#allocation5 + $0x1], 1 }

</bundles_post_ra>
